<compile_context>
chip_gen: v6e
topology: v6e:2x2x1
jax: 0.10.0
libtpu: 0.0.40
codegen_flags: <defaults>
</compile_context>

<pallas_src>
import jax
import jax.numpy as jnp
from jax import lax
from jax.experimental import pallas as pl
from jax.experimental.pallas import tpu as pltpu


def _vq_kernel(z_ref, e_aug_ref, e_t_ref, zq_ref, idx_ref, err_ref):
    """One grid step: a (C_pad, tm) tile of tokens against the full codebook.

    z_ref     : (C_pad, tm)   token tile; rows [0,e_dim) = features, row e_dim = 1.0,
                              remaining pad rows = 0.  Tokens on the 128-lane axis.
    e_aug_ref : (n_e, C_pad)  [-2*E | ||E||^2 | 0...]   (grid-invariant)
    e_t_ref   : (C_pad, n_e)  [E^T ; ones ; 0...]       (grid-invariant)
    zq_ref    : (C_pad, tm)   quantized tokens (pad rows match z pad rows)
    idx_ref   : (1, tm)       argmin codebook indices (lane-dense)
    err_ref   : (1, tm)       per-token ||z_q - z||^2 (reduced in the wrapper)
    """
    z = z_ref[...].astype(jnp.float32)                                     # (C_pad, tm)
    n_e = e_aug_ref.shape[0]
    tm = z.shape[1]

    # d[j, t] = ||e_j||^2 - 2 e_j . z_t  (token-constant ||z_t||^2 dropped: argmin
    # unchanged).  The +||e_j||^2 rides on the ones-row of z via the augmented matmul.
    d = jnp.dot(e_aug_ref[...], z, preferred_element_type=jnp.float32)     # (n_e, tm)

    # argmin over the codebook axis (first minimal index, matching torch/jnp argmin)
    d_min = jnp.min(d, axis=0, keepdims=True)                              # (1, tm)
    iota = lax.broadcasted_iota(jnp.int32, (n_e, tm), 0)
    idx = jnp.min(jnp.where(d == d_min, iota, n_e), axis=0, keepdims=True) # (1, tm)

    # one-hot gather of the codebook via MXU matmul (iota==idx so `masked` is dead)
    onehot = (iota == idx).astype(jnp.float32)                             # (n_e, tm)
    z_q = jnp.dot(e_t_ref[...], onehot, preferred_element_type=jnp.float32)  # (C_pad, tm)

    zq_ref[...] = z_q.astype(zq_ref.dtype)
    idx_ref[...] = idx

    diff = z_q - z                       # pad rows cancel exactly (1-1 and 0-0)
    err_ref[...] = jnp.sum(diff * diff, axis=0, keepdims=True)             # (1, tm)


def _round_up(x, m):
    return ((x + m - 1) // m) * m


def vector_quantizer_forward(z, embedding, beta, *, legacy=True, tm=512):
    """Equivalent of VectorQuantizer.forward (remap=None, sane_index_shape=False).

    z:         (B, C, H, W) float (NCHW, as in PyTorch), C == e_dim
    embedding: (n_e, e_dim) float
    returns (z_q [NCHW], loss, (None, None, min_encoding_indices))
    """
    B, C, H, W = z.shape
    e_dim = C
    n_e = embedding.shape[0]
    assert embedding.shape[1] == e_dim
    assert tm % 128 == 0, "tile size must be a multiple of the 128-lane width"

    HW = H * W
    # Pad features to a sublane multiple, reserving one row for the "ones" row that
    # carries ||E||^2 through the distance matmul.
    C_pad = _round_up(e_dim + 1, 8)

    # Tile size: cap by spatial extent and by a VMEM budget so the ~4 live (n_e, tm)
    # f32 temporaries stay under ~24 MiB (v7x has 64 MiB/TC; v5e scoped default 16 MiB).
    tm_eff = min(tm, _round_up(HW, 128))
    max_tm_vmem = (24 * 1024 * 1024) // max(1, 4 * 4 * n_e)
    max_tm_vmem = max(128, (max_tm_vmem // 128) * 128)
    tm_eff = max(128, min(tm_eff, max_tm_vmem))

    num_tiles = pl.cdiv(HW, tm_eff)
    HW_pad = num_tiles * tm_eff

    # z viewed as (B, C, HW) - a free reshape, no HBM transpose.  One pad pass adds the
    # zero feature rows / token padding and the ones-row (fused by XLA).
    zv = z.reshape(B, C, HW)
    zp = jnp.pad(zv, ((0, 0), (0, C_pad - C), (0, HW_pad - HW)))
    zp = zp.at[:, e_dim, :].set(jnp.ones((), zp.dtype))            # ones row

    # Hoisted, grid-invariant codebook-side precomputation.
    e_f32 = embedding.astype(jnp.float32)                          # (n_e, e_dim)
    e_sq = jnp.sum(e_f32 * e_f32, axis=1, keepdims=True)           # (n_e, 1)
    e_aug = jnp.concatenate(
        [-2.0 * e_f32, e_sq, jnp.zeros((n_e, C_pad - e_dim - 1), jnp.float32)], axis=1)
    e_t = jnp.concatenate(
        [e_f32.T, jnp.ones((1, n_e), jnp.float32),
         jnp.zeros((C_pad - e_dim - 1, n_e), jnp.float32)], axis=0)  # (C_pad, n_e)

    zq_p, idx_p, err_p = pl.pallas_call(
        _vq_kernel,
        out_shape=(
            jax.ShapeDtypeStruct((B, C_pad, HW_pad), z.dtype),
            jax.ShapeDtypeStruct((B, 1, HW_pad), jnp.int32),
            jax.ShapeDtypeStruct((B, 1, HW_pad), jnp.float32),
        ),
        grid_spec=pltpu.PrefetchScalarGridSpec(
            num_scalar_prefetch=0,
            grid=(B, num_tiles),
            in_specs=[
                pl.BlockSpec((None, C_pad, tm_eff), lambda b, i: (b, 0, i)),  # z tile
                pl.BlockSpec((n_e, C_pad), lambda b, i: (0, 0)),              # [-2E|e_sq]
                pl.BlockSpec((C_pad, n_e), lambda b, i: (0, 0)),              # [E^T;1]
            ],
            out_specs=[
                pl.BlockSpec((None, C_pad, tm_eff), lambda b, i: (b, 0, i)),
                pl.BlockSpec((None, 1, tm_eff), lambda b, i: (b, 0, i)),
                pl.BlockSpec((None, 1, tm_eff), lambda b, i: (b, 0, i)),
            ],
        ),
        # No cross-step state -> fully parallel grid (both TCs on v7x).
        compiler_params=pltpu.CompilerParams(
            dimension_semantics=("parallel", "parallel"),
            vmem_limit_bytes=48 * 1024 * 1024,
        ),
    )(zp, e_aug, e_t)

    # Loss: mean over the N = B*HW real tokens (feature / token padding sliced away).
    N = B * HW
    mse = jnp.sum(err_p[:, 0, :HW]) / jnp.float32(N * e_dim)       # mean((z_q - z)^2)
    if legacy:
        # mean((z_q.detach()-z)^2) + beta*mean((z_q - z.detach())^2) -> (1+beta)*mse fwd
        loss = mse + beta * mse
    else:
        loss = beta * mse + mse

    # Straight-through estimator z + (z_q - z).detach() == z_q in the forward value.
    # TODO(synk): no custom_vjp here - gradients (STE + detach semantics) are not reproduced.
    z_q = zq_p[:, :C, :HW].reshape(B, C, H, W)                     # already NCHW

    # Flat (N,) indices in torch order: b*H*W + h*W + w.
    min_encoding_indices = idx_p[:, 0, :HW].reshape(-1)
    perplexity = None
    min_encodings = None
    # TODO(synk): remap_to_used / sane_index_shape paths not implemented (remap=None here).
    return z_q, loss, (perplexity, min_encodings, min_encoding_indices)


def _reference(z, embedding, beta):
    B, C, H, W = z.shape
    z_flat = jnp.transpose(z, (0, 2, 3, 1)).reshape(-1, C)
    d = (jnp.sum(z_flat ** 2, 1, keepdims=True)
         + jnp.sum(embedding ** 2, 1)
         - 2.0 * z_flat @ embedding.T)
    idx = jnp.argmin(d, axis=1)
    zq_flat = embedding[idx]
    z_q = jnp.transpose(zq_flat.reshape(B, H, W, C), (0, 3, 1, 2))
    mse = jnp.mean((zq_flat - z_flat) ** 2)
    return z_q, mse + beta * mse, idx


if __name__ == "__main__":
    key = jax.random.PRNGKey(0)
    k_z, k_e = jax.random.split(key)

    # Module config: n_e codebook entries of dim e_dim == C, beta commitment weight.
    B, C, H, W = 2, 4, 16, 16
    n_e, e_dim, beta = 16, C, 0.25

    z = jax.random.normal(k_z, (B, C, H, W), jnp.float32)
    # nn.Embedding(n_e, e_dim).weight.uniform_(-1/n_e, 1/n_e), deterministic init
    embedding = jax.random.uniform(k_e, (n_e, e_dim), jnp.float32,
                                   minval=-1.0 / n_e, maxval=1.0 / n_e)

    # 1) default tile size (tm auto-capped to HW=256)
    z_q, loss, (_, _, idx) = vector_quantizer_forward(z, embedding, beta)
    jax.block_until_ready((z_q, loss, idx))

    zq_ref, loss_ref, idx_ref = _reference(z, embedding, beta)
    assert jnp.array_equal(idx, idx_ref.astype(jnp.int32))
    assert jnp.allclose(z_q, zq_ref, atol=1e-5, rtol=1e-5)
    assert jnp.allclose(loss, loss_ref, atol=1e-5, rtol=1e-5)

    # 2) multi-batch grid + padding path (HW = 100 is not a multiple of 128)
    B2, H2, W2 = 2, 10, 10
    z2 = jax.random.normal(jax.random.PRNGKey(1), (B2, C, H2, W2), jnp.float32)
    z_q2, loss2, (_, _, idx2) = vector_quantizer_forward(z2, embedding, beta, tm=128)
    jax.block_until_ready((z_q2, loss2, idx2))

    zq2_ref, loss2_ref, idx2_ref = _reference(z2, embedding, beta)
    assert jnp.array_equal(idx2, idx2_ref.astype(jnp.int32))
    assert jnp.allclose(z_q2, zq2_ref, atol=1e-5, rtol=1e-5)
    assert jnp.allclose(loss2, loss2_ref, atol=1e-5, rtol=1e-5)

    print("KERNEL_OK")
</pallas_src>

<mosaic_0001>
module attributes {stable_mosaic.version = 11 : i64} {
  func.func @_vq_kernel(%arg0: i32, %arg1: i32, %arg2: memref<1x8x256xf32, #tpu.memory_space<vmem>>, %arg3: memref<16x8xf32, #tpu.memory_space<vmem>>, %arg4: memref<8x16xf32, #tpu.memory_space<vmem>>, %arg5: memref<1x8x256xf32, #tpu.memory_space<vmem>>, %arg6: memref<1x1x256xi32, #tpu.memory_space<vmem>>, %arg7: memref<1x1x256xf32, #tpu.memory_space<vmem>>) attributes {dimension_semantics = [#tpu.dimension_semantics<parallel>, #tpu.dimension_semantics<parallel>], iteration_bounds = array<i64: 2, 1>, scalar_prefetch = 0 : i64, scratch_operands = 0 : i64, tpu.core_type = #tpu.core_type<tc>, window_params = [{transform_indices = @transform_0, window_bounds = array<i64: 1, 8, 256>}, {pipeline_mode = #tpu.pipeline_mode<synchronous>, transform_indices = @transform_1, window_bounds = array<i64: 16, 8>}, {pipeline_mode = #tpu.pipeline_mode<synchronous>, transform_indices = @transform_2, window_bounds = array<i64: 8, 16>}, {transform_indices = @transform_3, window_bounds = array<i64: 1, 8, 256>}, {transform_indices = @transform_4, window_bounds = array<i64: 1, 1, 256>}, {transform_indices = @transform_5, window_bounds = array<i64: 1, 1, 256>}]} {
    %c0 = arith.constant 0 : index
    %c0_0 = arith.constant 0 : index
    %c0_1 = arith.constant 0 : index
    %0 = vector.load %arg2[%c0, %c0_0, %c0_1] : memref<1x8x256xf32, #tpu.memory_space<vmem>>, vector<1x8x256xf32>
    %1 = vector.shape_cast %0 : vector<1x8x256xf32> to vector<8x256xf32>
    %c0_2 = arith.constant 0 : index
    %c0_3 = arith.constant 0 : index
    %2 = vector.load %arg3[%c0_2, %c0_3] : memref<16x8xf32, #tpu.memory_space<vmem>>, vector<16x8xf32>
    %cst = arith.constant dense<0.000000e+00> : vector<16x256xf32>
    %3 = tpu.matmul %2, %1, %cst {dimension_numbers = #tpu.dot_dimension_numbers<[1], [0], [0], [1], [0, 0, 1, 1], [], []>} : vector<16x8xf32>, vector<8x256xf32>, vector<16x256xf32> -> vector<16x256xf32>
    %cst_4 = arith.constant dense<0x7F800000> : vector<256xf32>
    %4 = vector.multi_reduction <minimumf>, %3, %cst_4 [0] : vector<16x256xf32> to vector<256xf32>
    %5 = vector.shape_cast %4 : vector<256xf32> to vector<1x256xf32>
    %6 = tpu.iota {dimensions = array<i32: 0>} : vector<16x256xi32>
    %7 = vector.broadcast %5 : vector<1x256xf32> to vector<16x256xf32>
    %8 = arith.cmpf oeq, %3, %7 : vector<16x256xf32>
    %c16_i32 = arith.constant 16 : i32
    %9 = vector.broadcast %c16_i32 : i32 to vector<16x256xi32>
    %10 = arith.select %8, %6, %9 : vector<16x256xi1>, vector<16x256xi32>
    %cst_5 = arith.constant dense<2147483647> : vector<256xi32>
    %11 = vector.multi_reduction <minsi>, %10, %cst_5 [0] : vector<16x256xi32> to vector<256xi32>
    %12 = vector.shape_cast %11 : vector<256xi32> to vector<1x256xi32>
    %13 = vector.broadcast %12 : vector<1x256xi32> to vector<16x256xi32>
    %14 = arith.cmpi eq, %6, %13 : vector<16x256xi32>
    %15 = arith.extui %14 : vector<16x256xi1> to vector<16x256xi32>
    %16 = arith.sitofp %15 : vector<16x256xi32> to vector<16x256xf32>
    %c0_6 = arith.constant 0 : index
    %c0_7 = arith.constant 0 : index
    %17 = vector.load %arg4[%c0_6, %c0_7] : memref<8x16xf32, #tpu.memory_space<vmem>>, vector<8x16xf32>
    %cst_8 = arith.constant dense<0.000000e+00> : vector<8x256xf32>
    %18 = tpu.matmul %17, %16, %cst_8 {dimension_numbers = #tpu.dot_dimension_numbers<[1], [0], [0], [1], [0, 0, 1, 1], [], []>} : vector<8x16xf32>, vector<16x256xf32>, vector<8x256xf32> -> vector<8x256xf32>
    %c0_9 = arith.constant 0 : index
    %c0_10 = arith.constant 0 : index
    %c0_11 = arith.constant 0 : index
    %19 = vector.load %arg5[%c0_9, %c0_10, %c0_11] : memref<1x8x256xf32, #tpu.memory_space<vmem>>, vector<1x8x256xf32>
    %20 = vector.shape_cast %19 : vector<1x8x256xf32> to vector<8x256xf32>
    %21 = vector.shape_cast %18 : vector<8x256xf32> to vector<1x8x256xf32>
    tpu.vector_store %arg5[%c0_9, %c0_10, %c0_11], %21 {strides = array<i32>} : memref<1x8x256xf32, #tpu.memory_space<vmem>>, vector<1x8x256xf32>,
    %c0_12 = arith.constant 0 : index
    %c0_13 = arith.constant 0 : index
    %c0_14 = arith.constant 0 : index
    %22 = vector.load %arg6[%c0_12, %c0_13, %c0_14] : memref<1x1x256xi32, #tpu.memory_space<vmem>>, vector<1x1x256xi32>
    %23 = vector.shape_cast %22 : vector<1x1x256xi32> to vector<1x256xi32>
    %24 = vector.shape_cast %12 : vector<1x256xi32> to vector<1x1x256xi32>
    tpu.vector_store %arg6[%c0_12, %c0_13, %c0_14], %24 {strides = array<i32>} : memref<1x1x256xi32, #tpu.memory_space<vmem>>, vector<1x1x256xi32>,
    %25 = arith.subf %18, %1 : vector<8x256xf32>
    %26 = arith.mulf %25, %25 : vector<8x256xf32>
    %cst_15 = arith.constant dense<0.000000e+00> : vector<256xf32>
    %27 = vector.multi_reduction <add>, %26, %cst_15 [0] : vector<8x256xf32> to vector<256xf32>
    %28 = vector.shape_cast %27 : vector<256xf32> to vector<1x256xf32>
    %c0_16 = arith.constant 0 : index
    %c0_17 = arith.constant 0 : index
    %c0_18 = arith.constant 0 : index
    %29 = vector.load %arg7[%c0_16, %c0_17, %c0_18] : memref<1x1x256xf32, #tpu.memory_space<vmem>>, vector<1x1x256xf32>
    %30 = vector.shape_cast %29 : vector<1x1x256xf32> to vector<1x256xf32>
    %31 = vector.shape_cast %28 : vector<1x256xf32> to vector<1x1x256xf32>
    tpu.vector_store %arg7[%c0_16, %c0_17, %c0_18], %31 {strides = array<i32>} : memref<1x1x256xf32, #tpu.memory_space<vmem>>, vector<1x1x256xf32>,
    return
  }
  func.func @transform_0(%arg0: i32, %arg1: i32) -> (i32, i32, i32) {
    %c0_i32 = arith.constant 0 : i32
    %c0_i32_0 = arith.constant 0 : i32
    return %arg0, %c0_i32, %arg1 : i32, i32, i32
  }
  func.func @transform_1(%arg0: i32, %arg1: i32) -> (i32, i32) {
    %c0_i32 = arith.constant 0 : i32
    %c0_i32_0 = arith.constant 0 : i32
    %c0_i32_1 = arith.constant 0 : i32
    return %c0_i32, %c0_i32_0 : i32, i32
  }
  func.func @transform_2(%arg0: i32, %arg1: i32) -> (i32, i32) {
    %c0_i32 = arith.constant 0 : i32
    %c0_i32_0 = arith.constant 0 : i32
    %c0_i32_1 = arith.constant 0 : i32
    return %c0_i32, %c0_i32_0 : i32, i32
  }
  func.func @transform_3(%arg0: i32, %arg1: i32) -> (i32, i32, i32) {
    %c0_i32 = arith.constant 0 : i32
    %c0_i32_0 = arith.constant 0 : i32
    return %arg0, %c0_i32, %arg1 : i32, i32, i32
  }
  func.func @transform_4(%arg0: i32, %arg1: i32) -> (i32, i32, i32) {
    %c0_i32 = arith.constant 0 : i32
    %c0_i32_0 = arith.constant 0 : i32
    return %arg0, %c0_i32, %arg1 : i32, i32, i32
  }
  func.func @transform_5(%arg0: i32, %arg1: i32) -> (i32, i32, i32) {
    %c0_i32 = arith.constant 0 : i32
    %c0_i32_0 = arith.constant 0 : i32
    return %arg0, %c0_i32, %arg1 : i32, i32, i32
  }
}

</mosaic_0001>

<bundles_post_ra>
// kernel: tpu_custom_call.1
= control target key start
LH: loop header
LB: loop body
LE: loop exit
PB: predicated region body
PF: predicated region fallthrough
CT: control target
= control target key end

     0   :  { %11 = vsyncpa [#allocation3], 0  ;;  %s1325_s0 = inlined_call_operand.hbm [shape: f32[2,8,256], index: 0, kind: input, shape index: {}]   ;;  %s1326_s1 = inlined_call_operand.vmem [shape: f32[16,8], index: 1, kind: input, shape index: {}]   ;;  %s1327_s2 = inlined_call_operand.vmem [shape: f32[8,16], index: 2, kind: input, shape index: {}]   ;;  %s1328_s3 = inlined_call_operand.hbm [shape: f32[2,8,256], index: 3, kind: output, shape index: {0}]   ;;  %s1329_s4 = inlined_call_operand.hbm [shape: s32[2,1,256], index: 4, kind: output, shape index: {1}]   ;;  %s1330_s5 = inlined_call_operand.hbm [shape: f32[2,1,256], index: 5, kind: output, shape index: {2}]  }
   0x1   :  { %13 = vsyncpa [#allocation3 + $0x1], 0 }
   0x2   :  { %14 = vsyncpa [#allocation4], 0 }
   0x3   :  { %16 = vsyncpa [#allocation4 + $0x1], 0 }
   0x4   :  { %17 = vsyncpa [#allocation7], 0 }
   0x5   :  { %19 = vsyncpa [#allocation7 + $0x1], 0  ;;  %s1091_s18 = smov 0   ;;  %s1093_s19 = smov 0  }
   0x6   :  { %s1095_s20 = smov 0   ;;  %s1097_s21 = smov 0  }
   0x7   :  { %s1099_s22 = smov 0   ;;  %s1101_s23 = smov 0  }
   0x8 LB: > { %s1122_s24 = sadd.s32 4294967295, %s1052_s23   ;;  %s1331_s25 = sadd.s32 4294967294, %s1052_s23   ;;  %s1052_s23 = sphi %s1101_s23, %s25_s23   ;;  %s1048_s22 = sphi %s1099_s22, %s1350_s22   ;;  %s1044_s21 = sphi %s1097_s21, %s1349_s21   ;;  %s1040_s20 = sphi %s1095_s20, %s1348_s20   ;;  %s1036_s19 = sphi %s1093_s19, %s1347_s19   ;;  %s1032_s18 = sphi %s1091_s18, %s1346_s18  }
   0x9   : > { %s37_s26 = sadd.s32 1, %s1048_s22  ;;  %s46_s27 = sadd.s32 1, %s1040_s20 }
   0xa   : > { %p39_p0 = scmp.ge.s32.totalorder %s37_s26, 2  ;;  %p53_p1 = scmp.ne.s32.totalorder %s1040_s20, %s1036_s19 }
   0xb   : > { %p54_p2 = scmp.eq.s32.totalorder %s1052_s23, 0  ;;  %p59_p3 = scmp.ne.s32.totalorder %s1036_s19, %s1032_s18 }
   0xc   : > { %s1352_s26 = smov (%p39_p0, %s37_s26), 0  ;;  %p60_p5 = scmp.eq.s32.totalorder %s1122_s24, 0 }
   0xd   : > { %p1134_p4 = por %p54_p2, %p53_p1  ;;  %s41_s29 = ssub.s32 %s1048_s22, %s1352_s26 }
   0xe   : > { %p127_p6 = scmp.eq.s32.totalorder %s1122_s24, 1  ;;  %p44_p7 = scmp.eq.s32.totalorder %s41_s29, 0 }
   0xf   : > { %p1142_p8 = por %p60_p5, %p59_p3  ;;  %p133_p10 = scmp.eq.s32.totalorder %s1331_s25, 1 }
  0x10   : > { %p1146_p9 = por %p127_p6, %p53_p1  ;;  %p835_p13 = scmp.lt.s32.totalorder %s1052_s23, 2 }
  0x11   : > { %s1153_s7 = scalar_select %p44_p7, %s1040_s20, %s46_s27  }
  0x12   : > { %p1155_p11 = por %p133_p10, %p59_p3  ;;  %s215_s9 = sand.u32 1, %s1040_s20  }
  0x13   : > { %s779_s10 = sshll.u32 %s215_s9, 4  ;;  %s809_s11 = sshll.u32 %s1048_s22, 8 }
  0x14   : > { %s1337_s8 = scalar_select %p1155_p11, 1, 0 }
  0x15   : > { %s227_s14 = scalar_lea.hbm %s1325_s0, %s809_s11  ;;  %s219_s15 = scalar_lea.vmem [#allocation2], %s779_s10 }
  0x16   : > { %s229_s16 = sshll.u32 %s219_s15, 4  ;;  %p1168_p0 = pnand %p835_p13, %p1134_p4  ;;  %s230_s16 = int_to_ptr.vmem [resolvable:$true] %s229_s16 }
  0x17   : > { %p782_p1 = scmp.ge.s32.totalorder %s1052_s23, 1  ;;  %p234_p2 = scmp.lt.s32.totalorder %s1052_s23, 3 }
  0x18   : > { %s216_s27 = scalar_lea.sflag [#allocation3], %s215_s9  ;;  %p890_p3 = pneg %p1168_p0 }
  0x19   : > { %s901_s29 = scalar_lea.vmem %s230_s16, 256  ;;  %s1054_s12 = smov [#allocation2]  }
  0x1a   : > { %p902_p5 = scmp.ne.s32.totalorder %s230_s16, %s901_s29  ;;  %s906_s11 = sshll.u32 %s1054_s12, 4  ;;  %s907_s11 = int_to_ptr.vmem [resolvable:$false] %s906_s11 }
  0x1b   : > { %s908_s10 = scalar_lea.vmem %s907_s11, 512  ;;  %p909_p10 = scmp.lt.s32.totalorder %s230_s16, %s907_s11 }
  0x1c   : > { %p904_p6 = pnand %p902_p5, %p890_p3  ;;  %p910_p12 = scmp.lt.s32.totalorder %s908_s10, %s901_s29 }
  0x1e   : > { %p905_p7 = pneg %p904_p6  ;;  %p911_p4 = por %p910_p12, %p909_p10 }
  0x20   : > { %p912_p13 = pnand %p911_p4, %p905_p7 }
  0x22   : > { %915 = shalt.err (!%p912_p13)
}
  0x23   : > { %824 = dma.hbm_to_vmem [thread:$0]  (!%p1168_p0), %s227_s14, 256, %s230_s16, %s216_s27  }
  0x24   : > { %p235_p11 = pnand %p782_p1, %p234_p2 }
  0x25   : > { %s1183_s28 = sand.u32 (!%p235_p11), 1, %s1036_s19  }
  0x26   : > { %238 = sbr.rel (%p235_p11) target bundleno = 522 (0x20a), region = 32  ;;  %s783_s9 = sshll.u32 (!%p235_p11), %s1183_s28, 4 }
  0x27   : > { %s241_s13 = scalar_lea.sflag (!%p235_p11), [#allocation3], %s1183_s28  ;;  %s244_s15 = scalar_lea.vmem (!%p235_p11), [#allocation2], %s783_s9 }
  0x2b   : > { %1019 = dma.done.wait (%p1142_p8), %s241_s13, 256  }
  0x2c   : > { %1021 = vsyncadd (%p1142_p8), %s241_s13, 4294967040  ;;  %v1055_v0 = vmov 0.0   ;;  %v1193_v1 = vld [vmem:[%s244_s15 + $0x8] sm:$0xff]  ;;  %v1195_v2 = vld [vmem:[%s244_s15] sm:$0xff]  ;;  %vm289_vm0 = vcmask 64512   ;;  %v387_v12 = vlaneseq  ;;  %s1332_s27 = sshll.u32 %s1183_s28, 1 }
  0x2d   : > { %360 = vmatprep.mubr.f32.mxu0 %v1055_v0  ;;  %501 = vmatprep.mubr.f32.mxu1 %v1055_v0  ;;  %v287_v3 = vld [vmem:[%s1326_s1] sm:$0xff]  ;;  %v288_v4 = vld [vmem:[%s1326_s1 + $0x8] sm:$0xff]  ;;  %v1056_v36 = vmov 1966171168   ;;  %v1057_v49 = vmov 1.0   ;;  %s273_s11 = scalar_lea.vmem [#allocation6], %s1332_s27 }
  0x2e   : > { %326 = vmatprep.subr.mxu0 %v1193_v1  ;;  %v388_v17 = vshrl.u32 %v387_v12, 7  ;;  %v512_v37 = vunpack.c.l.s4 %v1056_v36  ;;  %v432_v51 = vld [vmem:[%s1327_s2] sm:$0xff]  ;;  %s570_s10 = sand.u32 1, %s1122_s24   ;;  %s1333_s13 = sshll.u32 %s1044_s21, 5 }
  0x2f   : > { %327 = vmatpush1.msra.mxu0 %v1195_v2  ;;  %s606_s16 = scalar_lea.hbm %s1329_s4, %s1333_s13  ;;  %s608_s30 = sshll.u32 %s273_s11, 4  ;;  %s609_s30 = int_to_ptr.vmem [resolvable:$true] %s608_s30 }
  0x30   : > { %787 = vmatmul.mubr.msk.f32.vlgmr.msra.gmra.mxu0 %vm289_vm0, %v287_v3  ;;  %v389_v22 = vadd.s32 8, %v388_v17  ;;  %v513_v42 = vunpack.c.0.s8 %v512_v37  ;;  %s1228_s17 = scalar_lea.sflag [#allocation7], %s570_s10  ;;  %s916_s29 = scalar_lea.vmem %s609_s30, 32 }
  0x31   : > { %366 = vmatprep.mubr.f32.mxu0 %v1055_v0  ;;  %p917_p8 = scmp.ne.s32.totalorder %s609_s30, %s916_s29  ;;  %s1058_s12 = smov [#allocation6]  }
  0x32   : > { %v1205_v46 = vsub.s32 %v513_v42, %v388_v17  ;;  %s920_s25 = sshll.u32 %s1058_s12, 4  ;;  %s921_s25 = int_to_ptr.vmem [resolvable:$false] %s920_s25 }
  0x33   : > { %p918_p11 = pnand %p917_p8, %p1146_p9  ;;  %s922_s27 = scalar_lea.vmem %s921_s25, 64 }
  0x34   : > { %788 = vmatmul.mubr.msk.f32.gmra.mxu0 %vm289_vm0, %v288_v4  ;;  %vm433_vm0 = vcmask 130048   ;;  %p923_p0 = scmp.lt.s32.totalorder %s609_s30, %s921_s25  ;;  %p924_p1 = scmp.lt.s32.totalorder %s922_s27, %s916_s29 }
  0x35   : > { %p919_p12 = pneg %p918_p11 }
  0x36   : > { %p925_p2 = por %p924_p1, %p923_p0 }
  0x38   : > { %p926_p3 = pnand %p925_p2, %p919_p12 }
  0xf0   : > { %v362_v5 = vpop.f32.mrf.mxu0 }
  0xf2   : > { %v364_v6 = vpop.f32.mrf.mxu0 }
  0xf4   : > { %v368_v7 = vpop.f32.mrf.mxu0 }
  0xf5   : > { %v373_v8 = vmin.f32 %v362_v5, %v368_v7 }
  0xf6   : > { %v370_v9 = vpop.f32.mrf.mxu0 }
  0xf7   : > { %v374_v10 = vrot.slane %v373_v8, 4  ;;  %v380_v11 = vmin.f32 %v364_v6, %v370_v9 }
  0xf9   : > { %v375_v13 = vmin.f32 %v373_v8, %v374_v10  ;;  %v381_v14 = vrot.slane %v380_v11, 4 }
  0xfb   : > { %v376_v15 = vrot.slane %v375_v13, 2  ;;  %v382_v16 = vmin.f32 %v380_v11, %v381_v14 }
  0xfd   : > { %v377_v18 = vmin.f32 %v375_v13, %v376_v15  ;;  %v383_v19 = vrot.slane %v382_v16, 2 }
  0xff   : > { %v378_v20 = vrot.slane %v377_v18, 1  ;;  %v384_v21 = vmin.f32 %v382_v16, %v383_v19 }
 0x101   : > { %v379_v23 = vmin.f32 %v377_v18, %v378_v20  ;;  %v385_v24 = vrot.slane %v384_v21, 1 }
 0x103   : > { %vm390_vm1 = vcmp.eq.f32.partialorder %v362_v5, %v379_v23  ;;  %vm392_vm2 = vcmp.eq.f32.partialorder %v368_v7, %v379_v23  ;;  %v386_v25 = vmin.f32 %v384_v21, %v385_v24 }
 0x104   : > { %v394_v26 = vsel %vm390_vm1, %v388_v17, 16  ;;  %v396_v27 = vsel %vm392_vm2, %v389_v22, 16  ;;  %vm1212_vm2 = vcmp.lt.s32.totalorder %v387_v12, 256 }
 0x105   : > { %vm398_vm3 = vcmp.lt.s32.totalorder %v394_v26, %v396_v27  ;;  %vm391_vm4 = vcmp.eq.f32.partialorder %v364_v6, %v386_v25  ;;  %vm393_vm5 = vcmp.eq.f32.partialorder %v370_v9, %v386_v25 }
 0x106   : > { %v399_v28 = vsel %vm398_vm3, %v394_v26, %v396_v27  ;;  %v395_v29 = vsel %vm391_vm4, %v388_v17, 16  ;;  %v397_v30 = vsel %vm393_vm5, %v389_v22, 16 }
 0x107   : > { %v400_v31 = vrot.slane %v399_v28, 4  ;;  %vm409_vm6 = vcmp.lt.s32.totalorder %v395_v29, %v397_v30 }
 0x108   : > { %v410_v32 = vsel %vm409_vm6, %v395_v29, %v397_v30 }
 0x109   : > { %vm401_vm7 = vcmp.lt.s32.totalorder %v399_v28, %v400_v31  ;;  %v411_v33 = vrot.slane %v410_v32, 4 }
 0x10a   : > { %v402_v34 = vsel %vm401_vm7, %v399_v28, %v400_v31 }
 0x10b   : > { %v403_v35 = vrot.slane %v402_v34, 2  ;;  %vm412_vm8 = vcmp.lt.s32.totalorder %v410_v32, %v411_v33 }
 0x10c   : > { %v413_v38 = vsel %vm412_vm8, %v410_v32, %v411_v33 }
 0x10d   : > { %v414_v39 = vrot.slane %v413_v38, 2  ;;  %vm404_vm9 = vcmp.lt.s32.totalorder %v402_v34, %v403_v35 }
 0x10e   : > { %v405_v40 = vsel %vm404_vm9, %v402_v34, %v403_v35 }
 0x10f   : > { %vm415_vm10 = vcmp.lt.s32.totalorder %v413_v38, %v414_v39  ;;  %v406_v41 = vrot.slane %v405_v40, 1 }
 0x110   : > { %v416_v43 = vsel %vm415_vm10, %v413_v38, %v414_v39 }
 0x111   : > { %v417_v44 = vrot.slane %v416_v43, 1  ;;  %vm407_vm11 = vcmp.lt.s32.totalorder %v405_v40, %v406_v41 }
 0x112   : > { %v408_v45 = vsel %vm407_vm11, %v405_v40, %v406_v41 }
 0x113   : > { %vm418_vm12 = vcmp.lt.s32.totalorder %v416_v43, %v417_v44  ;;  %vm422_vm14 = vcmp.eq.s32.totalorder %v389_v22, %v408_v45  ;;  %vm420_vm1 = vcmp.eq.s32.totalorder %v388_v17, %v408_v45 }
 0x114   : > { %v419_v47 = vsel %vm418_vm12, %v416_v43, %v417_v44 }
 0x115   : > { %vm423_vm13 = vcmp.eq.s32.totalorder %v389_v22, %v419_v47  ;;  %v510_v48 = vcombine.low %v408_v45, %v419_v47  ;;  %vm421_vm15 = vcmp.eq.s32.totalorder %v388_v17, %v419_v47 }
 0x116   : > { %793 = vmatprep.subr.msk.mxu1 %vm423_vm13, %v1057_v49 }
 0x117   : > { %794 = vmatpush1.msk.msra.mxu1 %vm422_vm14, %v1057_v49  ;;  %v517_v50 = vrot.slane %v510_v48, %v1205_v46 }
 0x118   : > { %795 = vmatprep.subr.msk.mxu1 %vm421_vm15, %v1057_v49 }
 0x119   : > { %v524_v53 = vrot.slane %v517_v50, %v1205_v46  ;;  %796 = vmatpush1.msk.msra.mxu1 %vm420_vm1, %v1057_v49 }
 0x11a   : > { %797 = vmatmul.mubr.msk.f32.vlgmr.msra.gmra.mxu1 %vm433_vm0, %v432_v51 }
 0x11b   : > { %529 = vst.msk [vmem:[%s273_s11] sm:$0x3] %vm1212_vm2, %v524_v53 }
 0x11c   : > { %929 = shalt.err (!%p926_p3)
}
 0x11d   : > { %s930_s24 = scalar_lea.hbm %s606_s16, 32  ;;  %s934_s15 = scalar_lea.hbm %s1329_s4, 64 }
 0x11e   : > { %p931_p5 = scmp.ne.s32.totalorder %s606_s16, %s930_s24  ;;  %p935_p10 = scmp.lt.s32.totalorder %s606_s16, %s1329_s4 }
 0x11f   : > { %p936_p4 = scmp.lt.s32.totalorder %s934_s15, %s930_s24 }
 0x120   : > { %p932_p6 = pnand %p931_p5, %p1146_p9 }
 0x121   : > { %p937_p13 = por %p936_p4, %p935_p10 }
 0x122   : > { %p933_p7 = pneg %p932_p6 }
 0x124   : > { %p938_p8 = pnand %p937_p13, %p933_p7 }
 0x126   : > { %941 = shalt.err (!%p938_p8)
}
 0x127   : > { %816 = dma.vmem_to_hbm [thread:$0]  (%p1146_p9), %s609_s30, 32, %s606_s16, %s1228_s17  }
 0x128   : > { %s266_s25 = scalar_lea.vmem [#allocation5], %s783_s9  ;;  %s810_s29 = sshll.u32 %s1044_s21, 8 }
 0x129   : > { %s592_s27 = sshll.u32 %s266_s25, 4  ;;  %s1252_s24 = scalar_lea.hbm %s1328_s3, %s810_s29  ;;  %s1246_s27 = int_to_ptr.vmem [resolvable:$true] %s592_s27 }
 0x12a   : > { %s566_s9 = scalar_lea.sflag [#allocation4], %s1183_s28  ;;  %s942_s16 = scalar_lea.vmem %s1246_s27, 256 }
 0x12b   : > { %p943_p11 = scmp.ne.s32.totalorder %s1246_s27, %s942_s16  ;;  %s1059_s30 = smov [#allocation5]  }
 0x12c   : > { %s946_s11 = sshll.u32 %s1059_s30, 4  ;;  %s947_s11 = int_to_ptr.vmem [resolvable:$false] %s946_s11 }
 0x12d   : > { %p944_p12 = pnand %p943_p11, %p1146_p9  ;;  %s948_s10 = scalar_lea.vmem %s947_s11, 512 }
 0x12e   : > { %p949_p1 = scmp.lt.s32.totalorder %s1246_s27, %s947_s11  ;;  %p950_p2 = scmp.lt.s32.totalorder %s948_s10, %s942_s16 }
 0x12f   : > { %p945_p0 = pneg %p944_p12 }
 0x130   : > { %p951_p3 = por %p950_p2, %p949_p1 }
 0x132   : > { %p952_p5 = pnand %p951_p3, %p945_p0 }
 0x1da   : > { %v503_v54 = vpop.f32.mrf.mxu1 }
 0x1db   : > { %508 = vst [vmem:[%s266_s25] sm:$0xff] %v503_v54  ;;  %v530_v55 = vsub.f32 %v503_v54, %v1195_v2 }
 0x1dc   : > { %v505_v56 = vpop.f32.mrf.mxu1 }
 0x1dd   : > { %v532_v57 = vmul.f32 %v530_v55, %v530_v55  ;;  %509 = vst [vmem:[%s266_s25 + $0x8] sm:$0xff] %v505_v56  ;;  %v531_v58 = vsub.f32 %v505_v56, %v1193_v1 }
 0x1de   : > { %955 = shalt.err (!%p952_p5)
}
 0x1df   : > { %s956_s15 = scalar_lea.hbm %s1252_s24, 256  ;;  %s960_s29 = scalar_lea.hbm %s1328_s3, 512 }
 0x1e0   : > { %p957_p6 = scmp.ne.s32.totalorder %s1252_s24, %s956_s15  ;;  %p961_p4 = scmp.lt.s32.totalorder %s1252_s24, %s1328_s3 }
 0x1e1   : > { %p962_p13 = scmp.lt.s32.totalorder %s960_s29, %s956_s15 }
 0x1e2   : > { %p958_p7 = pnand %p957_p6, %p1146_p9 }
 0x1e3   : > { %p963_p8 = por %p962_p13, %p961_p4 }
 0x1e4   : > { %p959_p10 = pneg %p958_p7 }
 0x1e6   : > { %p964_p11 = pnand %p963_p8, %p959_p10 }
 0x1e8   : > { %967 = shalt.err (!%p964_p11)
}
 0x1e9   : > { %815 = dma.vmem_to_hbm [thread:$0]  (%p1146_p9), %s1246_s27, 256, %s1252_s24, %s566_s9   ;;  %v534_v59 = vrot.slane %v532_v57, 4  ;;  %v533_v60 = vmul.f32 %v531_v58, %v531_v58 }
 0x1ea   : > { %s1341_s16 = sshll.u32 %s1183_s28, 1  ;;  %s1342_s27 = sshll.u32 %s1044_s21, 5 }
 0x1eb   : > { %v535_v61 = vadd.f32 %v534_v59, %v532_v57  ;;  %v540_v62 = vrot.slane %v533_v60, 4  ;;  %s280_s30 = scalar_lea.vmem [#allocation8], %s1341_s16  ;;  %s622_s10 = scalar_lea.hbm %s1330_s5, %s1342_s27 }
 0x1ec   : > { %s624_s11 = sshll.u32 %s280_s30, 4  ;;  %s1060_s28 = smov [#allocation8]   ;;  %s625_s11 = int_to_ptr.vmem [resolvable:$true] %s624_s11 }
 0x1ed   : > { %v536_v63 = vrot.slane %v535_v61, 2  ;;  %v541_v0 = vadd.f32 %v540_v62, %v533_v60  ;;  %s968_s15 = scalar_lea.vmem %s625_s11, 32  ;;  %s972_s14 = sshll.u32 %s1060_s28, 4  ;;  %s973_s14 = int_to_ptr.vmem [resolvable:$false] %s972_s14 }
 0x1ee   : > { %p969_p12 = scmp.ne.s32.totalorder %s625_s11, %s968_s15  ;;  %s974_s25 = scalar_lea.vmem %s973_s14, 64 }
 0x1ef   : > { %v537_v1 = vadd.f32 %v536_v63, %v535_v61  ;;  %v542_v2 = vrot.slane %v541_v0, 2  ;;  %p975_p2 = scmp.lt.s32.totalorder %s625_s11, %s973_s14  ;;  %p976_p3 = scmp.lt.s32.totalorder %s974_s25, %s968_s15 }
 0x1f0   : > { %p970_p0 = pnand %p969_p12, %p1146_p9 }
 0x1f1   : > { %v538_v3 = vrot.slane %v537_v1, 1  ;;  %v543_v4 = vadd.f32 %v542_v2, %v541_v0  ;;  %p977_p5 = por %p976_p3, %p975_p2 }
 0x1f2   : > { %p971_p1 = pneg %p970_p0 }
 0x1f3   : > { %v544_v5 = vrot.slane %v543_v4, 1  ;;  %v539_v6 = vadd.f32 %v538_v3, %v537_v1 }
 0x1f4   : > { %p978_p6 = pnand %p977_p5, %p971_p1 }
 0x1f5   : > { %v545_v7 = vadd.f32 %v544_v5, %v543_v4 }
 0x1f7   : > { %v548_v8 = vcombine.low %v539_v6, %v545_v7 }
 0x1f9   : > { %v555_v9 = vrot.slane %v548_v8, %v1205_v46 }
 0x1fb   : > { %v562_v10 = vrot.slane %v555_v9, %v1205_v46 }
 0x1fd   : > { %564 = vst.msk [vmem:[%s280_s30] sm:$0x3] %vm1212_vm2, %v562_v10 }
 0x1fe   : > { %981 = shalt.err (!%p978_p6)
}
 0x1ff   : > { %s982_s21 = scalar_lea.hbm %s622_s10, 32  ;;  %s986_s12 = scalar_lea.hbm %s1330_s5, 64 }
 0x200   : > { %p983_p7 = scmp.ne.s32.totalorder %s622_s10, %s982_s21  ;;  %p987_p13 = scmp.lt.s32.totalorder %s622_s10, %s1330_s5 }
 0x201   : > { %p988_p8 = scmp.lt.s32.totalorder %s986_s12, %s982_s21 }
 0x202   : > { %p984_p10 = pnand %p983_p7, %p1146_p9 }
 0x203   : > { %p989_p11 = por %p988_p8, %p987_p13 }
 0x204   : > { %p985_p4 = pneg %p984_p10 }
 0x206   : > { %p990_p12 = pnand %p989_p11, %p985_p4 }
 0x208   : > { %993 = shalt.err (!%p990_p12)
}
 0x209   : > { %817 = dma.vmem_to_hbm [thread:$0]  (%p1146_p9), %s625_s11, 32, %s622_s10, %s1228_s17  }
 0x20a PF: > { %s636_s27 = sand.u32 1, %s1032_s18   ;;  %p1343_p0 = scmp.ne.s32.totalorder %s1337_s8, 0 }
 0x20b   : > { %p1344_p1 = scmp.ge.s32.totalorder %s1052_s23, 2  ;;  %s637_s24 = scalar_lea.sflag [#allocation4], %s636_s27 }
 0x20d   : > { %p826_p2 = pnand %p1344_p1, %p1343_p0 }
 0x20f   : > { %p827_p3 = pneg %p826_p2 }
 0x211   : > { %1023 = dma.done.wait (%p827_p3), %s637_s24, 256  }
 0x212   : > { %1025 = vsyncadd (%p827_p3), %s637_s24, 4294967040  ;;  %s1345_s9 = sadd.s32 4294967294, %s1052_s23  }
 0x213   : > { %s645_s15 = sand.u32 1, %s1345_s9  }
 0x214   : > { %s646_s28 = scalar_lea.sflag [#allocation7], %s645_s15 }
 0x215   : > { %1027 = dma.done.wait (%p827_p3), %s646_s28, 64  }
 0x216   : > { %1029 = vsyncadd (%p827_p3), %s646_s28, 4294967232  ;;  %s25_s23 = sadd.s32 1, %s1052_s23   ;;  %s1346_s18 = smov %s1036_s19 }
 0x217   : > { %p22_p9 = scmp.ge.s32.totalorder %s25_s23, 4   ;;  %s1347_s19 = smov %s1040_s20 }
 0x218   : > { %s1348_s20 = smov %s1153_s7  ;;  %s1349_s21 = smov %s1048_s22 }
 0x219   : > { %s1350_s22 = smov %s1352_s26  ;;  %24 = sbr.rel (!%p22_p9) target bundleno = 8 (0x8), region = 109 }
 0x21e   :  { %660 = vsyncpa [#allocation3], 1 }
 0x21f   :  { %662 = vsyncpa [#allocation3 + $0x1], 1 }
 0x220   :  { %663 = vsyncpa [#allocation4], 1 }
 0x221   :  { %665 = vsyncpa [#allocation4 + $0x1], 1 }
 0x222   :  { %666 = vsyncpa [#allocation7], 1 }
 0x223   :  { %668 = vsyncpa [#allocation7 + $0x1], 1 }

</bundles_post_ra>
